<compile_context>
chip_gen: v7x
topology: tpu7x:2x2x1
jax: 0.10.0
libtpu: 0.0.40
codegen_flags: <defaults>
</compile_context>

<pallas_src>
import jax
import jax.numpy as jnp
from jax import lax
from jax.experimental import pallas as pl
from jax.experimental.pallas import tpu as pltpu


# ----------------------------------------------------------------------------
# Tiling helpers
# ----------------------------------------------------------------------------
def _round_up(a, b):
    return (a + b - 1) // b * b


def _choose_tiles(hw, c_block, t_len, itemsize):
    """Pick (pixel_tile, padded_hw, t_block, padded_t)."""
    # lane-dense pixel tile: multiple of 128, capped so blocks stay small.
    t_pix = min(_round_up(hw, 128), 1024)
    hw_pad = _round_up(hw, t_pix)
    # time block: keep the x block <= ~1 MiB per buffer, at most 8 unrolled steps.
    per_t = max(1, c_block * t_pix * itemsize)
    t_blk = max(1, min(t_len, 8, (1 << 20) // per_t))
    t_pad = _round_up(t_len, t_blk)
    return t_pix, hw_pad, t_blk, t_pad


def _pad_axis(a, axis, new_size):
    if a.shape[axis] == new_size:
        return a
    pads = [(0, 0)] * a.ndim
    pads[axis] = (0, new_size - a.shape[axis])
    return jnp.pad(a, pads)


# ----------------------------------------------------------------------------
# Kernel 1: grouped temporal weighted sum (att_mean with 1 head, att_group)
# ----------------------------------------------------------------------------
def _wsum_kernel(x_ref, w_ref, o_ref, acc_ref):
    # x_ref : (1, Tb, 1, Cg, tP)   native dtype
    # w_ref : (1, Tb, 1, tP)       float32
    # o_ref : (1, 1, Cg, tP)       x dtype
    # acc   : (Cg, tP)             float32, resident across the T grid axis
    t = pl.program_id(3)
    t_blk = x_ref.shape[1]

    @pl.when(t == 0)
    def _():
        acc_ref[...] = jnp.zeros_like(acc_ref)

    acc = acc_ref[...]
    for tb in range(t_blk):                              # static unroll
        xv = x_ref[0, tb, 0].astype(jnp.float32)         # (Cg, tP)
        wv = w_ref[0, tb].astype(jnp.float32)            # (1, tP)
        acc = acc + wv * xv
    acc_ref[...] = acc

    @pl.when(t == pl.num_programs(3) - 1)
    def _():
        o_ref[0, 0] = acc_ref[...].astype(o_ref.dtype)


def _weighted_sum_grouped(x5, w4, t_blk, t_pix):
    """out[n, g, c, p] = sum_t w4[g*B + n, t, 0, p] * x5[n, t, g, c, p]."""
    B, Tp, G, Cg, Pp = x5.shape
    grid = (G, B, Pp // t_pix, Tp // t_blk)
    return pl.pallas_call(
        _wsum_kernel,
        out_shape=jax.ShapeDtypeStruct((B, G, Cg, Pp), x5.dtype),
        grid_spec=pltpu.PrefetchScalarGridSpec(
            num_scalar_prefetch=0,
            grid=grid,
            in_specs=[
                pl.BlockSpec((1, t_blk, 1, Cg, t_pix),
                             lambda h, n, p, t: (n, t, h, 0, p)),
                pl.BlockSpec((1, t_blk, 1, t_pix),
                             lambda h, n, p, t: (h * B + n, t, 0, p)),
            ],
            out_specs=pl.BlockSpec((1, 1, Cg, t_pix),
                                   lambda h, n, p, t: (n, h, 0, p)),
            scratch_shapes=[pltpu.VMEM((Cg, t_pix), jnp.float32)],
        ),
        compiler_params=pltpu.CompilerParams(
            dimension_semantics=("parallel", "parallel", "parallel", "arbitrary"),
            vmem_limit_bytes=32 * 1024 * 1024,
        ),
    )(x5, w4)


# ----------------------------------------------------------------------------
# Kernel 2: temporal sum with per-(batch, t) scalar weights in SMEM ('mean')
# ----------------------------------------------------------------------------
def _mean_kernel(x_ref, w_ref, o_ref, acc_ref):
    # x_ref : (1, Tb, C, tP)   native dtype
    # w_ref : (B * Tp,)        float32, whole array resident in SMEM
    # o_ref : (1, C, tP)       x dtype
    # acc   : (C, tP)          float32
    n = pl.program_id(0)
    t = pl.program_id(2)
    t_blk = x_ref.shape[1]
    t_pad = t_blk * pl.num_programs(2)

    @pl.when(t == 0)
    def _():
        acc_ref[...] = jnp.zeros_like(acc_ref)

    acc = acc_ref[...]
    base = n * t_pad + t * t_blk
    for tb in range(t_blk):                              # static unroll
        wv = w_ref[base + tb]                            # f32 scalar from SMEM
        acc = acc + wv * x_ref[0, tb].astype(jnp.float32)
    acc_ref[...] = acc

    @pl.when(t == pl.num_programs(2) - 1)
    def _():
        o_ref[0] = acc_ref[...].astype(o_ref.dtype)


def _scalar_weighted_sum(x4, w_flat, t_blk, t_pix):
    """out[n, c, p] = sum_t w_flat[n*Tp + t] * x4[n, t, c, p]."""
    B, Tp, C, Pp = x4.shape
    grid = (B, Pp // t_pix, Tp // t_blk)
    return pl.pallas_call(
        _mean_kernel,
        out_shape=jax.ShapeDtypeStruct((B, C, Pp), x4.dtype),
        grid_spec=pltpu.PrefetchScalarGridSpec(
            num_scalar_prefetch=0,
            grid=grid,
            in_specs=[
                pl.BlockSpec((1, t_blk, C, t_pix), lambda n, p, t: (n, t, 0, p)),
                pl.BlockSpec(memory_space=pltpu.MemorySpace.SMEM),
            ],
            out_specs=pl.BlockSpec((1, C, t_pix), lambda n, p, t: (n, 0, p)),
            scratch_shapes=[pltpu.VMEM((C, t_pix), jnp.float32)],
        ),
        compiler_params=pltpu.CompilerParams(
            dimension_semantics=("parallel", "parallel", "arbitrary"),
            vmem_limit_bytes=32 * 1024 * 1024,
        ),
    )(x4, w_flat)


# ----------------------------------------------------------------------------
# Glue: attention-map resizing (matches nn.Upsample(bilinear, align_corners=False)
# and nn.AvgPool2d(kernel_size=k) used by the module).
# ----------------------------------------------------------------------------
def _avg_pool(a, k):
    # a: (N, T, h, w), square kernel k, stride k (nn.AvgPool2d default).
    s = lax.reduce_window(a, 0.0, lax.add, (1, 1, k, k), (1, 1, k, k), "VALID")
    return s / float(k * k)


# ----------------------------------------------------------------------------
# Temporal_Aggregator forward (all three modes, with / without pad_mask)
# ----------------------------------------------------------------------------
class TemporalAggregator:
    def __init__(self, mode="mean"):
        self.mode = mode

    def __call__(self, x, pad_mask=None, attn_mask=None):
        B, T, C, H, W = x.shape
        HW = H * W

        if self.mode == "mean":
            t_pix, hw_pad, t_blk, t_pad = _choose_tiles(HW, C, T, x.dtype.itemsize)
            x4 = x.reshape(B, T, C, HW)
            x4 = _pad_axis(_pad_axis(x4, 1, t_pad), 3, hw_pad)
            if pad_mask is None:
                w = jnp.full((B, T), 1.0 / T, jnp.float32)
            else:
                valid = jnp.logical_not(pad_mask).astype(jnp.float32)     # (B, T)
                count = valid.sum(axis=1, keepdims=True)
                # NOTE: a fully-padded sequence gives 0/0 = NaN, same hazard
                # as the original PyTorch module.
                w = valid / count
            w = _pad_axis(w, 1, t_pad).reshape(B * t_pad)
            out = _scalar_weighted_sum(x4, w, t_blk, t_pix)               # (B, C, hw_pad)
            return out[:, :, :HW].reshape(B, C, H, W)

        if self.mode == "att_mean":
            attn = attn_mask.mean(axis=0).astype(jnp.float32)             # (B, T, h, w)
            attn = jax.image.resize(attn, (B, T, H, W), method="bilinear",
                                    antialias=False)
            if pad_mask is not None:
                attn = attn * jnp.logical_not(pad_mask).astype(
                    jnp.float32)[:, :, None, None]
            return self._grouped(x, attn[None], 1)                        # 1 head

        if self.mode == "att_group":
            n_heads, b, t, h_a, w_a = attn_mask.shape
            attn = attn_mask.reshape(n_heads * b, t, h_a, w_a).astype(jnp.float32)
            if H > w_a:
                attn = jax.image.resize(attn, (n_heads * b, t, H, W),
                                        method="bilinear", antialias=False)
            else:
                attn = _avg_pool(attn, w_a // H)
            attn = attn.reshape(n_heads, b, t, H, W)
            if pad_mask is not None:
                attn = attn * jnp.logical_not(pad_mask).astype(
                    jnp.float32)[None, :, :, None, None]
            return self._grouped(x, attn, n_heads)

        raise ValueError(f"unknown mode {self.mode}")

    @staticmethod
    def _grouped(x, attn, n_heads):
        # x: (B, T, C, H, W); attn: (n_heads, B, T, H, W) float32
        B, T, C, H, W = x.shape
        HW = H * W
        assert C % n_heads == 0, "channels must be divisible by n_heads"
        Cg = C // n_heads
        t_pix, hw_pad, t_blk, t_pad = _choose_tiles(HW, Cg, T, x.dtype.itemsize)

        # Pure reshape (contiguous) — no HBM transpose of x.
        x5 = x.reshape(B, T, n_heads, Cg, HW)
        x5 = _pad_axis(_pad_axis(x5, 1, t_pad), 4, hw_pad)

        w4 = attn.reshape(n_heads * B, T, 1, HW)
        w4 = _pad_axis(_pad_axis(w4, 1, t_pad), 3, hw_pad)

        out = _weighted_sum_grouped(x5, w4, t_blk, t_pix)                 # (B, G, Cg, hw_pad)
        # (B, G, Cg, HW) -> (B, C, H, W): matches torch.cat over heads on dim=1.
        return out[..., :HW].reshape(B, C, H, W)


# ----------------------------------------------------------------------------
# Pure-JAX references for correctness checks
# ----------------------------------------------------------------------------
def _ref_mean(x, pad_mask):
    if pad_mask is None:
        return x.mean(axis=1)
    valid = jnp.logical_not(pad_mask).astype(x.dtype)
    out = (x * valid[:, :, None, None, None]).sum(axis=1)
    return out / valid.sum(axis=1)[:, None, None, None]


def _ref_att_mean(x, attn_mask, pad_mask):
    B, T, C, H, W = x.shape
    attn = attn_mask.mean(axis=0).astype(jnp.float32)
    attn = jax.image.resize(attn, (B, T, H, W), method="bilinear", antialias=False)
    if pad_mask is not None:
        attn = attn * jnp.logical_not(pad_mask).astype(jnp.float32)[:, :, None, None]
    return (x * attn[:, :, None, :, :]).sum(axis=1)


def _ref_att_group(x, attn_mask, pad_mask):
    B, T, C, H, W = x.shape
    n_heads, b, t, h_a, w_a = attn_mask.shape
    attn = attn_mask.reshape(n_heads * b, t, h_a, w_a).astype(jnp.float32)
    if H > w_a:
        attn = jax.image.resize(attn, (n_heads * b, t, H, W), method="bilinear",
                                antialias=False)
    else:
        attn = _avg_pool(attn, w_a // H)
    attn = attn.reshape(n_heads, b, t, H, W)
    if pad_mask is not None:
        attn = attn * jnp.logical_not(pad_mask).astype(
            jnp.float32)[None, :, :, None, None]
    Cg = C // n_heads
    xg = x.reshape(B, T, n_heads, Cg, H, W)
    out = jnp.einsum("gbthw,btgchw->bgchw", attn, xg)
    return out.reshape(B, C, H, W)


# ----------------------------------------------------------------------------
if __name__ == "__main__":
    key = jax.random.PRNGKey(0)
    B, T, C, H, W = 2, 8, 4, 16, 16
    n_heads, h_att, w_att = 2, 8, 8

    k1, k2 = jax.random.split(key, 2)
    x = jax.random.normal(k1, (B, T, C, H, W), jnp.float32)
    attn_logits = jax.random.normal(k2, (n_heads, B, T, h_att, w_att), jnp.float32)
    attn_mask = jax.nn.softmax(attn_logits, axis=2)     # sums to 1 over T

    # pad mask: last two timesteps of batch 1 are padded
    pad_mask = jnp.zeros((B, T), dtype=bool).at[1, -2:].set(True)

    for mode in ("mean", "att_mean", "att_group"):
        agg = TemporalAggregator(mode)
        for pm in (None, pad_mask):
            out = agg(x, pad_mask=pm, attn_mask=attn_mask)
            out = jax.block_until_ready(out)
            assert out.shape == (B, C, H, W)
            if mode == "mean":
                want = _ref_mean(x, pm)
            elif mode == "att_mean":
                want = _ref_att_mean(x, attn_mask, pm)
            else:
                want = _ref_att_group(x, attn_mask, pm)
            assert jnp.allclose(out, want, atol=1e-4, rtol=1e-4), (
                f"mismatch in mode={mode}, pad={pm is not None}")

    print("KERNEL_OK")
</pallas_src>

<mosaic_0001>
module attributes {stable_mosaic.version = 11 : i64} {
  func.func @_mean_kernel(%arg0: i32, %arg1: i32, %arg2: i32, %arg3: memref<1x8x4x256xf32, #tpu.memory_space<vmem>>, %arg4: memref<16xf32, #tpu.memory_space<smem>>, %arg5: memref<1x4x256xf32, #tpu.memory_space<vmem>>, %arg6: memref<4x256xf32, #tpu.memory_space<vmem>>) attributes {dimension_semantics = [#tpu.dimension_semantics<parallel>, #tpu.dimension_semantics<parallel>, #tpu.dimension_semantics<arbitrary>], iteration_bounds = array<i64: 2, 1, 1>, scalar_prefetch = 0 : i64, scratch_operands = 1 : i64, tpu.core_type = #tpu.core_type<tc>, window_params = [{transform_indices = @transform_0, window_bounds = array<i64: 1, 8, 4, 256>}, {transform_indices = @transform_1, window_bounds = array<i64: 16>}, {transform_indices = @transform_2, window_bounds = array<i64: 1, 4, 256>}]} {
    %c0_i32 = arith.constant 0 : i32
    %0 = arith.cmpi eq, %arg2, %c0_i32 : i32
    %1 = arith.extui %0 : i1 to i32
    %c0_i32_0 = arith.constant 0 : i32
    %2 = arith.cmpi ne, %1, %c0_i32_0 : i32
    scf.if %2 {
      %cst = arith.constant 0.000000e+00 : f32
      %75 = vector.broadcast %cst : f32 to vector<4x256xf32>
      %c0_33 = arith.constant 0 : index
      %c0_34 = arith.constant 0 : index
      %76 = vector.load %arg6[%c0_33, %c0_34] : memref<4x256xf32, #tpu.memory_space<vmem>>, vector<4x256xf32>
      tpu.vector_store %arg6[%c0_33, %c0_34], %75 {strides = array<i32>} : memref<4x256xf32, #tpu.memory_space<vmem>>, vector<4x256xf32>,
    } else {
    }
    %c0 = arith.constant 0 : index
    %c0_1 = arith.constant 0 : index
    %3 = vector.load %arg6[%c0, %c0_1] : memref<4x256xf32, #tpu.memory_space<vmem>>, vector<4x256xf32>
    %c8_i32 = arith.constant 8 : i32
    %4 = arith.muli %arg0, %c8_i32 : i32
    %c8_i32_2 = arith.constant 8 : i32
    %5 = arith.muli %arg2, %c8_i32_2 : i32
    %6 = arith.addi %4, %5 : i32
    %c0_i32_3 = arith.constant 0 : i32
    %7 = arith.addi %6, %c0_i32_3 : i32
    %8 = arith.index_cast %7 : i32 to index
    %9 = memref.load %arg4[%8] : memref<16xf32, #tpu.memory_space<smem>>
    %c0_4 = arith.constant 0 : index
    %c0_5 = arith.constant 0 : index
    %c0_6 = arith.constant 0 : index
    %c0_7 = arith.constant 0 : index
    %10 = vector.load %arg3[%c0_4, %c0_5, %c0_6, %c0_7] : memref<1x8x4x256xf32, #tpu.memory_space<vmem>>, vector<1x1x4x256xf32>
    %11 = vector.shape_cast %10 : vector<1x1x4x256xf32> to vector<4x256xf32>
    %12 = vector.broadcast %9 : f32 to vector<4x256xf32>
    %13 = arith.mulf %12, %11 : vector<4x256xf32>
    %14 = arith.addf %3, %13 : vector<4x256xf32>
    %c1_i32 = arith.constant 1 : i32
    %15 = arith.addi %6, %c1_i32 : i32
    %16 = arith.index_cast %15 : i32 to index
    %17 = memref.load %arg4[%16] : memref<16xf32, #tpu.memory_space<smem>>
    %c0_8 = arith.constant 0 : index
    %c1 = arith.constant 1 : index
    %c0_9 = arith.constant 0 : index
    %c0_10 = arith.constant 0 : index
    %18 = vector.load %arg3[%c0_8, %c1, %c0_9, %c0_10] : memref<1x8x4x256xf32, #tpu.memory_space<vmem>>, vector<1x1x4x256xf32>
    %19 = vector.shape_cast %18 : vector<1x1x4x256xf32> to vector<4x256xf32>
    %20 = vector.broadcast %17 : f32 to vector<4x256xf32>
    %21 = arith.mulf %20, %19 : vector<4x256xf32>
    %22 = arith.addf %14, %21 : vector<4x256xf32>
    %c2_i32 = arith.constant 2 : i32
    %23 = arith.addi %6, %c2_i32 : i32
    %24 = arith.index_cast %23 : i32 to index
    %25 = memref.load %arg4[%24] : memref<16xf32, #tpu.memory_space<smem>>
    %c0_11 = arith.constant 0 : index
    %c2 = arith.constant 2 : index
    %c0_12 = arith.constant 0 : index
    %c0_13 = arith.constant 0 : index
    %26 = vector.load %arg3[%c0_11, %c2, %c0_12, %c0_13] : memref<1x8x4x256xf32, #tpu.memory_space<vmem>>, vector<1x1x4x256xf32>
    %27 = vector.shape_cast %26 : vector<1x1x4x256xf32> to vector<4x256xf32>
    %28 = vector.broadcast %25 : f32 to vector<4x256xf32>
    %29 = arith.mulf %28, %27 : vector<4x256xf32>
    %30 = arith.addf %22, %29 : vector<4x256xf32>
    %c3_i32 = arith.constant 3 : i32
    %31 = arith.addi %6, %c3_i32 : i32
    %32 = arith.index_cast %31 : i32 to index
    %33 = memref.load %arg4[%32] : memref<16xf32, #tpu.memory_space<smem>>
    %c0_14 = arith.constant 0 : index
    %c3 = arith.constant 3 : index
    %c0_15 = arith.constant 0 : index
    %c0_16 = arith.constant 0 : index
    %34 = vector.load %arg3[%c0_14, %c3, %c0_15, %c0_16] : memref<1x8x4x256xf32, #tpu.memory_space<vmem>>, vector<1x1x4x256xf32>
    %35 = vector.shape_cast %34 : vector<1x1x4x256xf32> to vector<4x256xf32>
    %36 = vector.broadcast %33 : f32 to vector<4x256xf32>
    %37 = arith.mulf %36, %35 : vector<4x256xf32>
    %38 = arith.addf %30, %37 : vector<4x256xf32>
    %c4_i32 = arith.constant 4 : i32
    %39 = arith.addi %6, %c4_i32 : i32
    %40 = arith.index_cast %39 : i32 to index
    %41 = memref.load %arg4[%40] : memref<16xf32, #tpu.memory_space<smem>>
    %c0_17 = arith.constant 0 : index
    %c4 = arith.constant 4 : index
    %c0_18 = arith.constant 0 : index
    %c0_19 = arith.constant 0 : index
    %42 = vector.load %arg3[%c0_17, %c4, %c0_18, %c0_19] : memref<1x8x4x256xf32, #tpu.memory_space<vmem>>, vector<1x1x4x256xf32>
    %43 = vector.shape_cast %42 : vector<1x1x4x256xf32> to vector<4x256xf32>
    %44 = vector.broadcast %41 : f32 to vector<4x256xf32>
    %45 = arith.mulf %44, %43 : vector<4x256xf32>
    %46 = arith.addf %38, %45 : vector<4x256xf32>
    %c5_i32 = arith.constant 5 : i32
    %47 = arith.addi %6, %c5_i32 : i32
    %48 = arith.index_cast %47 : i32 to index
    %49 = memref.load %arg4[%48] : memref<16xf32, #tpu.memory_space<smem>>
    %c0_20 = arith.constant 0 : index
    %c5 = arith.constant 5 : index
    %c0_21 = arith.constant 0 : index
    %c0_22 = arith.constant 0 : index
    %50 = vector.load %arg3[%c0_20, %c5, %c0_21, %c0_22] : memref<1x8x4x256xf32, #tpu.memory_space<vmem>>, vector<1x1x4x256xf32>
    %51 = vector.shape_cast %50 : vector<1x1x4x256xf32> to vector<4x256xf32>
    %52 = vector.broadcast %49 : f32 to vector<4x256xf32>
    %53 = arith.mulf %52, %51 : vector<4x256xf32>
    %54 = arith.addf %46, %53 : vector<4x256xf32>
    %c6_i32 = arith.constant 6 : i32
    %55 = arith.addi %6, %c6_i32 : i32
    %56 = arith.index_cast %55 : i32 to index
    %57 = memref.load %arg4[%56] : memref<16xf32, #tpu.memory_space<smem>>
    %c0_23 = arith.constant 0 : index
    %c6 = arith.constant 6 : index
    %c0_24 = arith.constant 0 : index
    %c0_25 = arith.constant 0 : index
    %58 = vector.load %arg3[%c0_23, %c6, %c0_24, %c0_25] : memref<1x8x4x256xf32, #tpu.memory_space<vmem>>, vector<1x1x4x256xf32>
    %59 = vector.shape_cast %58 : vector<1x1x4x256xf32> to vector<4x256xf32>
    %60 = vector.broadcast %57 : f32 to vector<4x256xf32>
    %61 = arith.mulf %60, %59 : vector<4x256xf32>
    %62 = arith.addf %54, %61 : vector<4x256xf32>
    %c7_i32 = arith.constant 7 : i32
    %63 = arith.addi %6, %c7_i32 : i32
    %64 = arith.index_cast %63 : i32 to index
    %65 = memref.load %arg4[%64] : memref<16xf32, #tpu.memory_space<smem>>
    %c0_26 = arith.constant 0 : index
    %c7 = arith.constant 7 : index
    %c0_27 = arith.constant 0 : index
    %c0_28 = arith.constant 0 : index
    %66 = vector.load %arg3[%c0_26, %c7, %c0_27, %c0_28] : memref<1x8x4x256xf32, #tpu.memory_space<vmem>>, vector<1x1x4x256xf32>
    %67 = vector.shape_cast %66 : vector<1x1x4x256xf32> to vector<4x256xf32>
    %68 = vector.broadcast %65 : f32 to vector<4x256xf32>
    %69 = arith.mulf %68, %67 : vector<4x256xf32>
    %70 = arith.addf %62, %69 : vector<4x256xf32>
    %c0_29 = arith.constant 0 : index
    %c0_30 = arith.constant 0 : index
    %71 = vector.load %arg6[%c0_29, %c0_30] : memref<4x256xf32, #tpu.memory_space<vmem>>, vector<4x256xf32>
    tpu.vector_store %arg6[%c0_29, %c0_30], %70 {strides = array<i32>} : memref<4x256xf32, #tpu.memory_space<vmem>>, vector<4x256xf32>,
    %c0_i32_31 = arith.constant 0 : i32
    %72 = arith.cmpi eq, %arg2, %c0_i32_31 : i32
    %73 = arith.extui %72 : i1 to i32
    %c0_i32_32 = arith.constant 0 : i32
    %74 = arith.cmpi ne, %73, %c0_i32_32 : i32
    scf.if %74 {
      %c0_33 = arith.constant 0 : index
      %c0_34 = arith.constant 0 : index
      %75 = vector.load %arg6[%c0_33, %c0_34] : memref<4x256xf32, #tpu.memory_space<vmem>>, vector<4x256xf32>
      %c0_35 = arith.constant 0 : index
      %c0_36 = arith.constant 0 : index
      %c0_37 = arith.constant 0 : index
      %76 = vector.load %arg5[%c0_35, %c0_36, %c0_37] : memref<1x4x256xf32, #tpu.memory_space<vmem>>, vector<1x4x256xf32>
      %77 = vector.shape_cast %76 : vector<1x4x256xf32> to vector<4x256xf32>
      %78 = vector.shape_cast %75 : vector<4x256xf32> to vector<1x4x256xf32>
      tpu.vector_store %arg5[%c0_35, %c0_36, %c0_37], %78 {strides = array<i32>} : memref<1x4x256xf32, #tpu.memory_space<vmem>>, vector<1x4x256xf32>,
    } else {
    }
    return
  }
  func.func @transform_0(%arg0: i32, %arg1: i32, %arg2: i32) -> (i32, i32, i32, i32) {
    %c0_i32 = arith.constant 0 : i32
    %c0_i32_0 = arith.constant 0 : i32
    return %arg0, %arg2, %c0_i32, %arg1 : i32, i32, i32, i32
  }
  func.func @transform_1(%arg0: i32, %arg1: i32, %arg2: i32) -> i32 {
    %c0_i32 = arith.constant 0 : i32
    %c0_i32_0 = arith.constant 0 : i32
    return %c0_i32 : i32
  }
  func.func @transform_2(%arg0: i32, %arg1: i32, %arg2: i32) -> (i32, i32, i32) {
    %c0_i32 = arith.constant 0 : i32
    %c0_i32_0 = arith.constant 0 : i32
    return %arg0, %c0_i32, %arg1 : i32, i32, i32
  }
}

</mosaic_0001>

<bundles_post_ra>
// kernel: tpu_custom_call.1
= control target key start
LH: loop header
LB: loop body
LE: loop exit
PB: predicated region body
PF: predicated region fallthrough
CT: control target
= control target key end

     0   :  { %7 = vsyncpa [#allocation4], 0  ;;  %s873_s0 = inlined_call_operand.hbm [shape: f32[2,8,4,256], index: 0, kind: input, shape index: {}]   ;;  %s874_s1 = inlined_call_operand.vmem [shape: f32[16], index: 1, kind: input, shape index: {}]   ;;  %s875_s2 = inlined_call_operand.hbm [shape: f32[2,4,256], index: 2, kind: output, shape index: {}]  }
   0x1   :  { %9 = vsyncpa [#allocation4 + $0x1], 0 }
   0x2   :  { %10 = vsyncpa [#allocation6], 0 }
   0x3   :  { %11 = vsyncpa [#allocation5], 0 }
   0x4   :  { %13 = vsyncpa [#allocation5 + $0x1], 0  ;;  %s651_s9 = smov 0   ;;  %s653_s10 = smov 0  }
   0x5   :  { %s655_s11 = smov 0   ;;  %s657_s12 = smov 0  }
   0x6   :  { %s659_s13 = smov 0   ;;  %s661_s14 = smov 0  }
   0x7 LB: > { %s396_s15 = sadd.s32 4294967295, %s629_s14   ;;  %s397_s16 = sadd.s32 4294967294, %s629_s14   ;;  %s629_s14 = sphi %s661_s14, %s19_s14   ;;  %s625_s13 = sphi %s659_s13, %s898_s13   ;;  %s621_s12 = sphi %s657_s12, %s897_s12   ;;  %s617_s11 = sphi %s655_s11, %s896_s11   ;;  %s613_s10 = sphi %s653_s10, %s895_s10   ;;  %s609_s9 = sphi %s651_s9, %s894_s9  }
   0x8   : > { %s49_s17 = sadd.s32 1, %s617_s11  ;;  %p56_p0 = scmp.ne.s32.totalorder %s617_s11, %s613_s10 }
   0x9   : > { %p57_p1 = scmp.eq.s32.totalorder %s629_s14, 0  ;;  %p62_p2 = scmp.ne.s32.totalorder %s613_s10, %s609_s9 }
   0xa   : > { %p689_p3 = scmp.eq.s32.totalorder %s396_s15, 0  ;;  %p109_p4 = scmp.eq.s32.totalorder %s396_s15, 1 }
   0xb   : > { %p693_p5 = por %p57_p1, %p56_p0  ;;  %p115_p6 = scmp.eq.s32.totalorder %s397_s16, 1 }
   0xc   : > { %s880_s18 = scalar_select %p689_p3, 1, 0 }
   0xd   : > { %p699_p7 = por %p689_p3, %p62_p2  ;;  %p703_p8 = por %p109_p4, %p56_p0 }
   0xe   : > { %p707_p9 = por %p115_p6, %p62_p2  ;;  %p398_p10 = scmp.ge.s32.totalorder %s629_s14, 1 }
   0xf   : > { %s882_s20 = scalar_select %p699_p7, 1, 0 }
  0x10   : > { %s883_s21 = scalar_select %p703_p8, 1, 0 }
  0x11   : > { %s884_s22 = scalar_select %p707_p9, 1, 0 }
  0x12   : > { %p122_p11 = scmp.lt.s32.totalorder %s629_s14, 3  ;;  %s135_s25 = sshll.u32 %s874_s1, 4  ;;  %s136_s25 = int_to_ptr.vmem [resolvable:$true] %s135_s25 }
  0x13   : > { %p444_p0 = scmp.lt.s32.totalorder %s629_s14, 2  ;;  %s38_s29 = sadd.s32 1, %s625_s13 }
  0x14   : > { %p716_p12 = pnand %p398_p10, %p122_p11  ;;  %p737_p6 = scmp.ge.s32.totalorder %s38_s29, 2 }
  0x15   : > { %p726_p2 = pnand %p444_p0, %p693_p5  ;;  %s146_s3 = sand.u32 1, %s617_s11  }
  0x16   : > { %p431_p1 = pneg %p716_p12  ;;  %s498_s4 = scalar_lea.vmem %s136_s25, 16 }
  0x17   : > { %p499_p10 = scmp.ne.s32.totalorder %s136_s25, %s498_s4  ;;  %p506_p13 = scmp.lt.s32.totalorder %s136_s25, %s136_s25 }
  0x18   : > { %p732_p4 = pnand %p431_p1, %p689_p3  ;;  %p507_p9 = scmp.lt.s32.totalorder %s498_s4, %s498_s4 }
  0x1a   : > { %p500_p11 = pneg %p732_p4  ;;  %p508_p8 = por %p507_p9, %p506_p13 }
  0x1c   : > { %p501_p5 = pnand %p500_p11, %p499_p10 }
  0x1e   : > { %p502_p0 = pneg %p501_p5 }
  0x20   : > { %p509_p1 = pnand %p508_p8, %p502_p0 }
  0x22   : > { %512 = shalt.err (!%p509_p1)
}
  0x23   : > { %s631_s5 = smov [#allocation7]   ;;  %s900_s29 = smov (%p737_p6, %s38_s29), 0 }
  0x24   : > { %434 = dma.vmem_to_smem (!%p732_p4), %s136_s25, 16, %s631_s5, [#allocation6]  }
  0x25   : > { %s401_s6 = sshll.u32 %s146_s3, 6  ;;  %s42_s7 = ssub.s32 %s625_s13, %s900_s29 }
  0x26   : > { %p47_p9 = scmp.eq.s32.totalorder %s42_s7, 0  ;;  %s421_s8 = sshll.u32 %s625_s13, 10 }
  0x27   : > { %s756_s19 = scalar_lea.hbm %s873_s0, %s421_s8  ;;  %s150_s23 = scalar_lea.vmem [#allocation3], %s401_s6 }
  0x28   : > { %s162_s24 = sshll.u32 %s150_s23, 4  ;;  %s765_s28 = scalar_lea.sflag [#allocation4], %s146_s3  ;;  %s763_s24 = int_to_ptr.vmem [resolvable:$true] %s162_s24 }
  0x29   : > { %s761_s25 = scalar_select %p47_p9, %s617_s11, %s49_s17  }
  0x2a   : > { %s513_s30 = scalar_lea.hbm %s756_s19, 1024  ;;  %p515_p13 = pneg %p726_p2 }
  0x2b   : > { %p514_p8 = scmp.ne.s32.totalorder %s756_s19, %s513_s30  ;;  %s518_s6 = scalar_lea.hbm %s873_s0, 2048 }
  0x2c   : > { %p519_p10 = scmp.lt.u32.totalorder %s756_s19, %s873_s0  ;;  %p520_p11 = scmp.lt.u32.totalorder %s518_s6, %s513_s30 }
  0x2d   : > { %p516_p4 = pnand %p515_p13, %p514_p8  ;;  %p522_p0 = scmp.lt.u32.totalorder %s513_s30, %s756_s19 }
  0x2e   : > { %p521_p5 = por %p520_p11, %p519_p10 }
  0x2f   : > { %p517_p6 = pneg %p516_p4 }
  0x30   : > { %p523_p1 = por %p522_p0, %p521_p5 }
  0x32   : > { %p524_p9 = pnand %p523_p1, %p517_p6 }
  0x34   : > { %527 = shalt.err (!%p524_p9)
}
  0x35   : > { %s528_s17 = scalar_lea.vmem %s763_s24, 1024  ;;  %s632_s3 = smov [#allocation3]  }
  0x36   : > { %p529_p8 = scmp.ne.s32.totalorder %s763_s24, %s528_s17  ;;  %s533_s15 = sshll.u32 %s632_s3, 4  ;;  %s534_s15 = int_to_ptr.vmem [resolvable:$false] %s533_s15 }
  0x37   : > { %s535_s16 = scalar_lea.vmem %s534_s15, 2048  ;;  %p536_p7 = scmp.lt.s32.totalorder %s763_s24, %s534_s15 }
  0x38   : > { %p531_p4 = pnand %p529_p8, %p515_p13  ;;  %p537_p10 = scmp.lt.s32.totalorder %s535_s16, %s528_s17 }
  0x3a   : > { %p532_p3 = pneg %p531_p4  ;;  %p538_p11 = por %p537_p10, %p536_p7 }
  0x3c   : > { %p539_p5 = pnand %p538_p11, %p532_p3 }
  0x3e   : > { %542 = shalt.err (!%p539_p5)
}
  0x3f   : > { %s633_s23 = smov 128   ;;  %s634_s30 = smov 8  }
  0x40   : > { %438 = dma.hbm_to_vmem [thread:$0]  (!%p726_p2), %s756_s19, 1024, %s763_s24, %s765_s28, %s633_s23, %s633_s23, %s634_s30  }
  0x41   : > { %174 = sbr.rel (%p716_p12) target bundleno = 117 (0x75), region = 28  ;;  %s796_s4 = sand.u32 (!%p716_p12), 1, %s613_s10  }
  0x42   : > { %s405_s5 = sshll.u32 (!%p716_p12), %s796_s4, 6  ;;  %s177_s6 = scalar_lea.sflag (!%p716_p12), [#allocation4], %s796_s4 }
  0x43   : > { %s800_s7 = scalar_lea.vmem (!%p716_p12), [#allocation3], %s405_s5  ;;  %p889_p3 = scmp.ne.s32.totalorder (!%p716_p12), %s882_s20, 0 }
  0x48   : > { %596 = dma.done.wait (%p889_p3), %s177_s6, 1024  }
  0x49   : > { %598 = vsyncadd (%p889_p3), %s177_s6, 4294966272  ;;  %p890_p7 = scmp.ne.s32.totalorder %s880_s18, 0 }
  0x4b   : > { %600 = dma.done.wait (%p890_p7), [#allocation6], 16  }
  0x4c   : > { %602 = vsyncadd (%p890_p7), [#allocation6], 4294967280 }
  0x4d   : > { %189 = sfence }
  0x4e   : > { %s408_s26 = sshll.u32 %s621_s12, 3  ;;  %v219_v0 = vld [vmem:[%s800_s7] sm:$0xff]  ;;  %v409_v2 = vld [vmem:[%s800_s7 + $0x8] sm:$0xff]  ;;  %v410_v3 = vld [vmem:[%s800_s7 + $0x10] sm:$0xff]  ;;  %p891_p2 = scmp.ne.s32.totalorder %s883_s21, 0 }
  0x4f   : > { %s218_s27 = sld [smem:[#allocation7 + %s408_s26]]  ;;  %s223_s19 = sadd.s32 1, %s408_s26  ;;  %v411_v7 = vld [vmem:[%s800_s7 + $0x18] sm:$0xff]  ;;  %v412_v11 = vld [vmem:[%s800_s7 + $0x20] sm:$0xff]  ;;  %v413_v15 = vld [vmem:[%s800_s7 + $0x28] sm:$0xff] }
  0x50   : > { %s230_s24 = sadd.s32 2, %s408_s26  ;;  %s224_s28 = sld [smem:[#allocation7 + %s223_s19]]  ;;  %v414_v19 = vld [vmem:[%s800_s7 + $0x30] sm:$0xff]  ;;  %v415_v23 = vld [vmem:[%s800_s7 + $0x38] sm:$0xff] }
  0x51   : > { %s231_s8 = sld [smem:[#allocation7 + %s230_s24]]  ;;  %s237_s17 = sadd.s32 3, %s408_s26 }
  0x52   : > { %s244_s20 = sadd.s32 4, %s408_s26  ;;  %s238_s3 = sld [smem:[#allocation7 + %s237_s17]] }
  0x53   : > { %s245_s15 = sld [smem:[#allocation7 + %s244_s20]]  ;;  %s251_s16 = sadd.s32 5, %s408_s26 }
  0x54   : > { %s258_s18 = sadd.s32 6, %s408_s26  ;;  %s252_s23 = sld [smem:[#allocation7 + %s251_s16]] }
  0x55   : > { %v220_v1 = vstv %s218_s27  ;;  %s259_s30 = sld [smem:[#allocation7 + %s258_s18]]  ;;  %s265_s5 = sadd.s32 7, %s408_s26 }
  0x56   : > { %v221_v4 = vmul.f32 %v220_v1, %v219_v0  ;;  %v227_v5 = vstv %s224_s28  ;;  %s266_s6 = sld [smem:[#allocation7 + %s265_s5]]  ;;  %s407_s27 = sshll.u32 %s796_s4, 3 }
  0x57   : > { %v234_v6 = vstv %s231_s8  ;;  %v228_v8 = vmul.f32 %v409_v2, %v227_v5  ;;  %s205_s26 = scalar_lea.vmem [#allocation8], %s407_s27  ;;  %s422_s24 = sshll.u32 %s621_s12, 7 }
  0x58   : > { %v235_v9 = vmul.f32 %v410_v3, %v234_v6  ;;  %v241_v10 = vstv %s238_s3  ;;  %s295_s19 = sshll.u32 %s205_s26, 4  ;;  %s826_s7 = scalar_lea.hbm %s875_s2, %s422_s24  ;;  %s821_s19 = int_to_ptr.vmem [resolvable:$true] %s295_s19 }
  0x59   : > { %v248_v12 = vstv %s245_s15  ;;  %v229_v13 = vadd.f32 %v228_v8, %v221_v4  ;;  %v242_v14 = vmul.f32 %v411_v7, %v241_v10  ;;  %s279_s17 = scalar_lea.sflag [#allocation5], %s796_s4  ;;  %s543_s20 = scalar_lea.vmem %s821_s19, 128 }
  0x5a   : > { %v255_v16 = vstv %s252_s23  ;;  %v249_v18 = vmul.f32 %v412_v11, %v248_v12  ;;  %p544_p12 = scmp.ne.s32.totalorder %s821_s19, %s543_s20  ;;  %s635_s12 = smov [#allocation8]  }
  0x5b   : > { %v236_v17 = vadd.f32 %v235_v9, %v229_v13  ;;  %v262_v20 = vstv %s259_s30  ;;  %v256_v22 = vmul.f32 %v413_v15, %v255_v16  ;;  %s547_s3 = sshll.u32 %s635_s12, 4  ;;  %s548_s3 = int_to_ptr.vmem [resolvable:$false] %s547_s3 }
  0x5c   : > { %v269_v24 = vstv %s266_s6  ;;  %v263_v26 = vmul.f32 %v414_v19, %v262_v20  ;;  %p545_p13 = pnand %p544_p12, %p891_p2  ;;  %s549_s15 = scalar_lea.vmem %s548_s3, 256 }
  0x5d   : > { %v243_v21 = vadd.f32 %v242_v14, %v236_v17  ;;  %v270_v28 = vmul.f32 %v415_v23, %v269_v24  ;;  %p550_p0 = scmp.lt.s32.totalorder %s821_s19, %s548_s3  ;;  %p551_p1 = scmp.lt.s32.totalorder %s549_s15, %s543_s20 }
  0x5e   : > { %p546_p6 = pneg %p545_p13 }
  0x5f   : > { %v250_v25 = vadd.f32 %v249_v18, %v243_v21  ;;  %p552_p9 = por %p551_p1, %p550_p0 }
  0x61   : > { %v257_v27 = vadd.f32 %v256_v22, %v250_v25  ;;  %p553_p8 = pnand %p552_p9, %p546_p6 }
  0x63   : > { %v264_v29 = vadd.f32 %v263_v26, %v257_v27 }
  0x65   : > { %v271_v30 = vadd.f32 %v270_v28, %v264_v29 }
  0x67   : > { %277 = vst [vmem:[%s205_s26] sm:$0xff] %v271_v30 }
  0x68   : > { %556 = shalt.err (!%p553_p8)
}
  0x69   : > { %s557_s4 = scalar_lea.hbm %s826_s7, 128  ;;  %s561_s23 = scalar_lea.hbm %s875_s2, 256 }
  0x6a   : > { %p558_p4 = scmp.ne.s32.totalorder %s826_s7, %s557_s4  ;;  %p562_p5 = scmp.lt.u32.totalorder %s826_s7, %s875_s2 }
  0x6b   : > { %p563_p3 = scmp.lt.u32.totalorder %s561_s23, %s557_s4  ;;  %p565_p12 = scmp.lt.u32.totalorder %s557_s4, %s826_s7 }
  0x6c   : > { %p559_p10 = pnand %p558_p4, %p891_p2 }
  0x6d   : > { %p564_p7 = por %p563_p3, %p562_p5 }
  0x6e   : > { %p560_p11 = pneg %p559_p10 }
  0x6f   : > { %p566_p13 = por %p565_p12, %p564_p7 }
  0x71   : > { %p567_p6 = pnand %p566_p13, %p560_p11 }
  0x73   : > { %570 = shalt.err (!%p567_p6)
}
  0x74   : > { %429 = dma.vmem_to_hbm [thread:$0]  (%p891_p2), %s821_s19, 128, %s826_s7, %s279_s17  }
  0x75 PF: > { %s307_s6 = sand.u32 1, %s609_s9   ;;  %p892_p0 = scmp.ne.s32.totalorder %s884_s22, 0 }
  0x76   : > { %p893_p1 = scmp.ge.s32.totalorder %s629_s14, 2  ;;  %s308_s27 = scalar_lea.sflag [#allocation5], %s307_s6 }
  0x78   : > { %p440_p9 = pnand %p893_p1, %p892_p0 }
  0x7a   : > { %604 = dma.done.wait (!%p440_p9), %s308_s27, 128  }
  0x7b   : > { %606 = vsyncadd (!%p440_p9), %s308_s27, 4294967168  ;;  %s19_s14 = sadd.s32 1, %s629_s14   ;;  %s894_s9 = smov %s613_s10 }
  0x7c   : > { %p16_p8 = scmp.ge.s32.totalorder %s19_s14, 4   ;;  %s895_s10 = smov %s617_s11 }
  0x7d   : > { %s896_s11 = smov %s761_s25  ;;  %s897_s12 = smov %s625_s13 }
  0x7e   : > { %s898_s13 = smov %s900_s29  ;;  %18 = sbr.rel (!%p16_p8) target bundleno = 7 (0x7), region = 93 }
  0x85   :  { %313 = vsyncpa [#allocation4], 1 }
  0x86   :  { %315 = vsyncpa [#allocation4 + $0x1], 1 }
  0x87   :  { %316 = vsyncpa [#allocation5], 1 }
  0x88   :  { %318 = vsyncpa [#allocation5 + $0x1], 1 }
  0x89   :  { %319 = vsyncpa [#allocation6], 1 }
  0x8a   :  { %321 = vsyncpa [#allocation6 + $0x1], 1 }

</bundles_post_ra>
